<compile_context>
chip_gen: v7x
topology: tpu7x:2x2x1
jax: 0.10.0
libtpu: 0.0.40
codegen_flags: <defaults>
</compile_context>

<pallas_src>
import functools

import jax
import jax.numpy as jnp
from jax import lax
from jax.experimental import pallas as pl
from jax.experimental.pallas import tpu as pltpu

LEAKY_SLOPE = 0.01      # torch.nn.LeakyReLU default negative_slope
NORMALIZE_EPS = 1e-12   # torch.nn.functional.normalize default eps


def _round_up(n: int, m: int) -> int:
    return ((n + m - 1) // m) * m


def _leaky_relu(x):
    return jnp.where(x > 0, x, LEAKY_SLOPE * x)


def output_network_kernel(x_ref, w1_ref, b1_ref, w2_ref, b2_ref,
                          wd_ref, bd_ref, o_ref):
    """Fused MLP (CombinedNetwork) + cartesian decoder (Linear + L2 normalize).

    MXU operands are bf16 (weights arrive pre-cast; the f32 x tile is cast
    in-kernel); accumulation, biases, activations and the normalize are f32.
    """
    cdt = w1_ref.dtype  # compute dtype for MXU inputs (bf16)

    # --- CombinedNetwork: Linear -> LeakyReLU -> Linear -> LeakyReLU ---
    h = jnp.dot(x_ref[...].astype(cdt), w1_ref[...],
                preferred_element_type=jnp.float32)
    h = _leaky_relu(h + b1_ref[...])
    h = jnp.dot(h.astype(cdt), w2_ref[...], preferred_element_type=jnp.float32)
    h = _leaky_relu(h + b2_ref[...])

    # --- OutputDecoder ('cartesian', normalize_output=True) ---
    y = jnp.dot(h.astype(cdt), wd_ref[...], preferred_element_type=jnp.float32)
    y = y + bd_ref[...]
    # F.normalize(y, dim=-1): y / max(||y||_2, eps) == y * rsqrt(max(sum(y^2), eps^2))
    sumsq = jnp.sum(y * y, axis=-1, keepdims=True)
    inv_norm = lax.rsqrt(jnp.maximum(sumsq, NORMALIZE_EPS * NORMALIZE_EPS))
    o_ref[...] = (y * inv_norm).astype(o_ref.dtype)


@functools.partial(jax.jit, static_argnames=("block_b",))
def _output_network_pallas(x, w1, b1, w2, b2, wd, bd, *, block_b):
    B, F = x.shape
    H1 = w1.shape[1]
    H2 = w2.shape[1]
    O = wd.shape[1]

    # Batch tile: multiple of 8 sublanes, capped by block_b (default 512).
    tb = min(block_b, _round_up(B, 8))
    Bp = _round_up(B, tb)

    xc = x
    if Bp != B:
        xc = jnp.pad(xc, ((0, Bp - B), (0, 0)))

    # Weights: one-time bf16 cast (tiny, resident in VMEM across all grid steps).
    w1c = w1.astype(jnp.bfloat16)
    w2c = w2.astype(jnp.bfloat16)
    wdc = wd.astype(jnp.bfloat16)
    b1f = b1.astype(jnp.float32)
    b2f = b2.astype(jnp.float32)
    bdf = bd.astype(jnp.float32)

    grid = (Bp // tb,)
    out = pl.pallas_call(
        output_network_kernel,
        out_shape=jax.ShapeDtypeStruct((Bp, O), jnp.float32),
        grid_spec=pltpu.PrefetchScalarGridSpec(
            num_scalar_prefetch=0,
            grid=grid,
            in_specs=[
                pl.BlockSpec((tb, F), lambda i: (i, 0)),     # x: tiled over batch
                pl.BlockSpec((F, H1), lambda i: (0, 0)),     # weights resident in VMEM
                pl.BlockSpec((1, H1), lambda i: (0, 0)),
                pl.BlockSpec((H1, H2), lambda i: (0, 0)),
                pl.BlockSpec((1, H2), lambda i: (0, 0)),
                pl.BlockSpec((H2, O), lambda i: (0, 0)),
                pl.BlockSpec((1, O), lambda i: (0, 0)),
            ],
            out_specs=pl.BlockSpec((tb, O), lambda i: (i, 0)),
        ),
        compiler_params=pltpu.CompilerParams(
            dimension_semantics=("parallel",),               # 2 TCs on v7x
        ),
    )(xc, w1c, b1f, w2c, b2f, wdc, bdf)

    if Bp != B:
        out = out[:B]
    return out


def output_network_forward(x, params, hiddens=None, *, block_b=512):
    """x: (B, input_size) float32. Returns ((B, 3) unit vectors, hiddens)."""
    w1, b1, w2, b2, wd, bd = params
    out = _output_network_pallas(x, w1, b1, w2, b2, wd, bd, block_b=block_b)
    return out, hiddens


def init_params(key, input_size, hidden1, hidden2):
    """Deterministic torch.nn.Linear-style init: U(-1/sqrt(fan_in), 1/sqrt(fan_in))."""
    ks = jax.random.split(key, 6)

    def lin(kw, kb, fan_in, fan_out):
        bound = 1.0 / jnp.sqrt(jnp.float32(fan_in))
        w = jax.random.uniform(kw, (fan_in, fan_out), jnp.float32, -bound, bound)
        b = jax.random.uniform(kb, (1, fan_out), jnp.float32, -bound, bound)
        return w, b

    w1, b1 = lin(ks[0], ks[1], input_size, hidden1)
    w2, b2 = lin(ks[2], ks[3], hidden1, hidden2)
    wd, bd = lin(ks[4], ks[5], hidden2, 3)   # OutputDecoder 'cartesian' head
    return (w1, b1, w2, b2, wd, bd)


def reference_forward(x, params):
    """Pure-JAX reference mirroring the kernel's mixed precision (bf16 MXU inputs,
    f32 accumulation / biases / activations)."""
    w1, b1, w2, b2, wd, bd = params

    def c(a):  # emulate bf16 rounding of MXU operands
        return a.astype(jnp.bfloat16).astype(jnp.float32)

    h = _leaky_relu(c(x) @ c(w1) + b1)
    h = _leaky_relu(c(h) @ c(w2) + b2)
    y = c(h) @ c(wd) + bd
    n = jnp.maximum(jnp.linalg.norm(y, axis=-1, keepdims=True), NORMALIZE_EPS)
    return y / n


if __name__ == "__main__":
    B = 10               # deliberately not a multiple of 8: exercises batch padding
    INPUT_SIZE = 32      # OutputNetwork input_size
    HIDDEN1 = 64         # CombinedNetwork hidden width
    HIDDEN2 = 64         # CombinedNetwork output_size (feeds OutputDecoder)

    key = jax.random.PRNGKey(0)
    kx, kp = jax.random.split(key)
    x = jax.random.normal(kx, (B, INPUT_SIZE), jnp.float32)
    params = init_params(kp, INPUT_SIZE, HIDDEN1, HIDDEN2)

    out, hiddens = output_network_forward(x, params, hiddens=None)
    out = jax.block_until_ready(out)

    ref = reference_forward(x, params)
    assert out.shape == (B, 3), out.shape
    assert hiddens is None
    max_err = float(jnp.max(jnp.abs(out - ref)))
    assert jnp.allclose(out, ref, atol=5e-3, rtol=5e-3), max_err
    # decoder normalizes output to unit vectors
    assert jnp.allclose(jnp.linalg.norm(out, axis=-1), 1.0, atol=5e-3)

    print("KERNEL_OK")
</pallas_src>

<mosaic_0001>
module attributes {stable_mosaic.version = 11 : i64} {
  func.func @output_network_kernel(%arg0: i32, %arg1: memref<16x32xf32, #tpu.memory_space<vmem>>, %arg2: memref<32x64xbf16, #tpu.memory_space<vmem>>, %arg3: memref<1x64xf32, #tpu.memory_space<vmem>>, %arg4: memref<64x64xbf16, #tpu.memory_space<vmem>>, %arg5: memref<1x64xf32, #tpu.memory_space<vmem>>, %arg6: memref<64x3xbf16, #tpu.memory_space<vmem>>, %arg7: memref<1x3xf32, #tpu.memory_space<vmem>>, %arg8: memref<16x3xf32, #tpu.memory_space<vmem>>) attributes {dimension_semantics = [#tpu.dimension_semantics<parallel>], iteration_bounds = array<i64: 1>, scalar_prefetch = 0 : i64, scratch_operands = 0 : i64, tpu.core_type = #tpu.core_type<tc>, window_params = [{transform_indices = @transform_0, window_bounds = array<i64: 16, 32>}, {pipeline_mode = #tpu.pipeline_mode<synchronous>, transform_indices = @transform_1, window_bounds = array<i64: 32, 64>}, {pipeline_mode = #tpu.pipeline_mode<synchronous>, transform_indices = @transform_2, window_bounds = array<i64: 1, 64>}, {pipeline_mode = #tpu.pipeline_mode<synchronous>, transform_indices = @transform_3, window_bounds = array<i64: 64, 64>}, {pipeline_mode = #tpu.pipeline_mode<synchronous>, transform_indices = @transform_4, window_bounds = array<i64: 1, 64>}, {pipeline_mode = #tpu.pipeline_mode<synchronous>, transform_indices = @transform_5, window_bounds = array<i64: 64, 3>}, {pipeline_mode = #tpu.pipeline_mode<synchronous>, transform_indices = @transform_6, window_bounds = array<i64: 1, 3>}, {transform_indices = @transform_7, window_bounds = array<i64: 16, 3>}]} {
    %c0 = arith.constant 0 : index
    %c0_0 = arith.constant 0 : index
    %0 = vector.load %arg1[%c0, %c0_0] : memref<16x32xf32, #tpu.memory_space<vmem>>, vector<16x32xf32>
    %1 = arith.truncf %0 : vector<16x32xf32> to vector<16x32xbf16>
    %c0_1 = arith.constant 0 : index
    %c0_2 = arith.constant 0 : index
    %2 = vector.load %arg2[%c0_1, %c0_2] : memref<32x64xbf16, #tpu.memory_space<vmem>>, vector<32x64xbf16>
    %cst = arith.constant dense<0.000000e+00> : vector<16x64xf32>
    %3 = tpu.matmul %1, %2, %cst {dimension_numbers = #tpu.dot_dimension_numbers<[1], [0], [0], [1], [0, 0, 1, 1], [], []>} : vector<16x32xbf16>, vector<32x64xbf16>, vector<16x64xf32> -> vector<16x64xf32>
    %c0_3 = arith.constant 0 : index
    %c0_4 = arith.constant 0 : index
    %4 = vector.load %arg3[%c0_3, %c0_4] : memref<1x64xf32, #tpu.memory_space<vmem>>, vector<1x64xf32>
    %5 = vector.broadcast %4 : vector<1x64xf32> to vector<16x64xf32>
    %6 = arith.addf %3, %5 : vector<16x64xf32>
    %cst_5 = arith.constant 0.000000e+00 : f32
    %7 = vector.broadcast %cst_5 : f32 to vector<16x64xf32>
    %8 = arith.cmpf ogt, %6, %7 : vector<16x64xf32>
    %cst_6 = arith.constant 0.00999999977 : f32
    %9 = vector.broadcast %cst_6 : f32 to vector<16x64xf32>
    %10 = arith.mulf %9, %6 : vector<16x64xf32>
    %11 = arith.select %8, %6, %10 : vector<16x64xi1>, vector<16x64xf32>
    %12 = arith.truncf %11 : vector<16x64xf32> to vector<16x64xbf16>
    %c0_7 = arith.constant 0 : index
    %c0_8 = arith.constant 0 : index
    %13 = vector.load %arg4[%c0_7, %c0_8] : memref<64x64xbf16, #tpu.memory_space<vmem>>, vector<64x64xbf16>
    %cst_9 = arith.constant dense<0.000000e+00> : vector<16x64xf32>
    %14 = tpu.matmul %12, %13, %cst_9 {dimension_numbers = #tpu.dot_dimension_numbers<[1], [0], [0], [1], [0, 0, 1, 1], [], []>} : vector<16x64xbf16>, vector<64x64xbf16>, vector<16x64xf32> -> vector<16x64xf32>
    %c0_10 = arith.constant 0 : index
    %c0_11 = arith.constant 0 : index
    %15 = vector.load %arg5[%c0_10, %c0_11] : memref<1x64xf32, #tpu.memory_space<vmem>>, vector<1x64xf32>
    %16 = vector.broadcast %15 : vector<1x64xf32> to vector<16x64xf32>
    %17 = arith.addf %14, %16 : vector<16x64xf32>
    %cst_12 = arith.constant 0.000000e+00 : f32
    %18 = vector.broadcast %cst_12 : f32 to vector<16x64xf32>
    %19 = arith.cmpf ogt, %17, %18 : vector<16x64xf32>
    %cst_13 = arith.constant 0.00999999977 : f32
    %20 = vector.broadcast %cst_13 : f32 to vector<16x64xf32>
    %21 = arith.mulf %20, %17 : vector<16x64xf32>
    %22 = arith.select %19, %17, %21 : vector<16x64xi1>, vector<16x64xf32>
    %23 = arith.truncf %22 : vector<16x64xf32> to vector<16x64xbf16>
    %c0_14 = arith.constant 0 : index
    %c0_15 = arith.constant 0 : index
    %24 = vector.load %arg6[%c0_14, %c0_15] : memref<64x3xbf16, #tpu.memory_space<vmem>>, vector<64x3xbf16>
    %cst_16 = arith.constant dense<0.000000e+00> : vector<16x3xf32>
    %25 = tpu.matmul %23, %24, %cst_16 {dimension_numbers = #tpu.dot_dimension_numbers<[1], [0], [0], [1], [0, 0, 1, 1], [], []>} : vector<16x64xbf16>, vector<64x3xbf16>, vector<16x3xf32> -> vector<16x3xf32>
    %c0_17 = arith.constant 0 : index
    %c0_18 = arith.constant 0 : index
    %26 = vector.load %arg7[%c0_17, %c0_18] : memref<1x3xf32, #tpu.memory_space<vmem>>, vector<1x3xf32>
    %27 = vector.broadcast %26 : vector<1x3xf32> to vector<16x3xf32>
    %28 = arith.addf %25, %27 : vector<16x3xf32>
    %29 = arith.mulf %28, %28 : vector<16x3xf32>
    %cst_19 = arith.constant dense<0.000000e+00> : vector<16xf32>
    %30 = vector.multi_reduction <add>, %29, %cst_19 [1] : vector<16x3xf32> to vector<16xf32>
    %31 = vector.shape_cast %30 : vector<16xf32> to vector<16x1xf32>
    %cst_20 = arith.constant 1.000000e-24 : f32
    %32 = vector.broadcast %cst_20 : f32 to vector<16x1xf32>
    %33 = arith.maximumf %31, %32 : vector<16x1xf32>
    %34 = math.rsqrt %33 : vector<16x1xf32>
    %35 = vector.broadcast %34 : vector<16x1xf32> to vector<16x3xf32>
    %36 = arith.mulf %28, %35 : vector<16x3xf32>
    %c0_21 = arith.constant 0 : index
    %c0_22 = arith.constant 0 : index
    %37 = vector.load %arg8[%c0_21, %c0_22] : memref<16x3xf32, #tpu.memory_space<vmem>>, vector<16x3xf32>
    tpu.vector_store %arg8[%c0_21, %c0_22], %36 {strides = array<i32>} : memref<16x3xf32, #tpu.memory_space<vmem>>, vector<16x3xf32>,
    return
  }
  func.func @transform_0(%arg0: i32) -> (i32, i32) {
    %c0_i32 = arith.constant 0 : i32
    %c0_i32_0 = arith.constant 0 : i32
    return %arg0, %c0_i32 : i32, i32
  }
  func.func @transform_1(%arg0: i32) -> (i32, i32) {
    %c0_i32 = arith.constant 0 : i32
    %c0_i32_0 = arith.constant 0 : i32
    %c0_i32_1 = arith.constant 0 : i32
    return %c0_i32, %c0_i32_0 : i32, i32
  }
  func.func @transform_2(%arg0: i32) -> (i32, i32) {
    %c0_i32 = arith.constant 0 : i32
    %c0_i32_0 = arith.constant 0 : i32
    %c0_i32_1 = arith.constant 0 : i32
    return %c0_i32, %c0_i32_0 : i32, i32
  }
  func.func @transform_3(%arg0: i32) -> (i32, i32) {
    %c0_i32 = arith.constant 0 : i32
    %c0_i32_0 = arith.constant 0 : i32
    %c0_i32_1 = arith.constant 0 : i32
    return %c0_i32, %c0_i32_0 : i32, i32
  }
  func.func @transform_4(%arg0: i32) -> (i32, i32) {
    %c0_i32 = arith.constant 0 : i32
    %c0_i32_0 = arith.constant 0 : i32
    %c0_i32_1 = arith.constant 0 : i32
    return %c0_i32, %c0_i32_0 : i32, i32
  }
  func.func @transform_5(%arg0: i32) -> (i32, i32) {
    %c0_i32 = arith.constant 0 : i32
    %c0_i32_0 = arith.constant 0 : i32
    %c0_i32_1 = arith.constant 0 : i32
    return %c0_i32, %c0_i32_0 : i32, i32
  }
  func.func @transform_6(%arg0: i32) -> (i32, i32) {
    %c0_i32 = arith.constant 0 : i32
    %c0_i32_0 = arith.constant 0 : i32
    %c0_i32_1 = arith.constant 0 : i32
    return %c0_i32, %c0_i32_0 : i32, i32
  }
  func.func @transform_7(%arg0: i32) -> (i32, i32) {
    %c0_i32 = arith.constant 0 : i32
    %c0_i32_0 = arith.constant 0 : i32
    return %arg0, %c0_i32 : i32, i32
  }
}

</mosaic_0001>

<bundles_post_ra>
// kernel: _output_network_pallas.1
= control target key start
LH: loop header
LB: loop body
LE: loop exit
PB: predicated region body
PF: predicated region fallthrough
CT: control target
= control target key end

     0   :  { %v377_v0 = vmov 0.0   ;;  %vm378_vm0 = vmmov 0   ;;  %vm53_vm1 = vcmask 261120   ;;  %vm144_vm4 = vcmask 523264   ;;  %s479_s1 = inlined_call_operand.vmem [shape: bf16[32,64], index: 1, kind: input, shape index: {}]   ;;  %s480_s0 = inlined_call_operand.vmem [shape: f32[16,32], index: 0, kind: input, shape index: {}]   ;;  %s481_s3 = inlined_call_operand.vmem [shape: bf16[64,64], index: 3, kind: input, shape index: {}]   ;;  %s482_s5 = inlined_call_operand.vmem [shape: bf16[64,3], index: 5, kind: input, shape index: {}]   ;;  %s483_s2 = inlined_call_operand.vmem [shape: f32[1,64], index: 2, kind: input, shape index: {}]   ;;  %s484_s4 = inlined_call_operand.vmem [shape: f32[1,64], index: 4, kind: input, shape index: {}]   ;;  %s485_s6 = inlined_call_operand.vmem [shape: f32[1,3], index: 6, kind: input, shape index: {}]   ;;  %s486_s7 = inlined_call_operand.vmem [shape: f32[16,3], index: 7, kind: output, shape index: {}]  }
   0x1   :  { %329 = vmatprep.subr.bf16.mxu0 %v377_v0  ;;  %v363_v1 = vld [vmem:[%s479_s1] sm:$0xff]   ;;  %333 = vmatprep.mubr.msk.bf16.mxu0 %vm378_vm0, %v377_v0  ;;  %v364_v2 = vld [vmem:[%s479_s1 + $0x8] sm:$0xff]   ;;  %v367_v8 = vld [vmem:[%s481_s3 + $0x10] sm:$0xff]   ;;  %vm281_vm7 = vcmask 23552  }
   0x2   :  { %337 = vmatprep.subr.bf16.mxu1 %v377_v0  ;;  %345 = vmatprep.mubr.msk.bf16.mxu1 %vm378_vm0, %v377_v0  ;;  %v27_v3 = vld [vmem:[%s480_s0] sm:$0xff]  ;;  %v28_v4 = vld [vmem:[%s480_s0 + $0x8] sm:$0xff]  ;;  %v368_v9 = vld [vmem:[%s481_s3 + $0x18] sm:$0xff]  }
   0x3   :  { %330 = vmatpush3.bf16.msra.mxu0 %v363_v1  ;;  %v365_v5 = vld [vmem:[%s481_s3] sm:$0xff]   ;;  %v366_v6 = vld [vmem:[%s481_s3 + $0x8] sm:$0xff]   ;;  %v29_v7 = vpack.c.bf16 %v28_v4, %v27_v3  ;;  %v371_v24 = vld [vmem:[%s482_s5 + $0x10] sm:$0xff]  }
   0x4   :  { %331 = vmatprep.subr.bf16.mxu0 %v377_v0  ;;  %338 = vmatpush3.bf16.msra.mxu1 %v365_v5  ;;  %v369_v10 = vld [vmem:[%s482_s5] sm:$0xff]   ;;  %v370_v11 = vld [vmem:[%s482_s5 + $0x8] sm:$0xff]   ;;  %v372_v25 = vld [vmem:[%s482_s5 + $0x18] sm:$0xff]  }
   0x5   :  { %339 = vmatprep.subr.bf16.mxu1 %v377_v0  ;;  %v300_v12 = vld [vmem:[%s483_s2] ss:$0 sm:$0xff] }
   0x6   :  { %v304_v26 = vld [vmem:[%s484_s4] ss:$0 sm:$0xff] }
   0x7   :  { %332 = vmatpush3.bf16.msra.mxu0 %v364_v2  ;;  %v310_v38 = vld [vmem:[%s485_s6] ss:$0 sm:$0xff] }
   0x8   :  { %349 = vmatprep.subr.bf16.mxu0 %v377_v0  ;;  %340 = vmatpush3.bf16.msra.mxu1 %v366_v6 }
   0x9   :  { %341 = vmatprep.subr.bf16.mxu1 %v377_v0 }
   0xa   :  { %334 = vmatmul.mubr.msk.bf16.vlgmr.msra.gmra.mrb[0].mxu0 %vm53_vm1, %v29_v7 }
   0xb   :  { %357 = vmatprep.mubr.msk.bf16.mxu0 %vm378_vm0, %v377_v0  ;;  %350 = vmatpush3.bf16.msra.mxu0 %v369_v10 }
   0xc   :  { %342 = vmatpush3.bf16.msra.mxu1 %v367_v8  ;;  %351 = vmatprep.subr.bf16.mxu0 %v377_v0 }
   0xd   :  { %343 = vmatprep.subr.bf16.mxu1 %v377_v0 }
   0xf   :  { %352 = vmatpush3.bf16.msra.mxu0 %v370_v11 }
  0x10   :  { %344 = vmatpush3.bf16.msra.mxu1 %v368_v9  ;;  %353 = vmatprep.subr.bf16.mxu0 %v377_v0 }
  0x13   :  { %354 = vmatpush3.bf16.msra.mxu0 %v371_v24 }
  0x14   :  { %355 = vmatprep.subr.bf16.mxu0 %v377_v0 }
  0x17   :  { %356 = vmatpush3.bf16.msra.mxu0 %v372_v25 }
  0xdd   :  { %v91_v13 = vpop.f32.mrb[0].mxu0 }
  0xde   :  { %v92_v14 = vadd.f32 %v300_v12, %v91_v13  ;;  %v335_v15 = vpop.f32.mrb[1].mxu0 }
  0xdf   :  { %v94_v16 = vpop.f32.mrb[2].mxu0 }
  0xe0   :  { %v100_v17 = vmul.f32 0.01, %v92_v14  ;;  %v95_v18 = vadd.f32 %v300_v12, %v94_v16  ;;  %v336_v19 = vpop.f32.mrb[3].mxu0  ;;  %vm98_vm2 = vcmp.gt.f32.partialorder %v92_v14, 0.0 }
  0xe2   :  { %vm99_vm3 = vcmp.gt.f32.partialorder %v95_v18, 0.0  ;;  %v101_v20 = vmul.f32 0.01, %v95_v18  ;;  %v102_v21 = vsel %vm98_vm2, %v92_v14, %v100_v17 }
  0xe4   :  { %v103_v22 = vsel %vm99_vm3, %v95_v18, %v101_v20 }
  0xe5   :  { %v104_v23 = vpack.c.bf16 %v103_v22, %v102_v21 }
  0xe7   :  { %346 = vmatmul.mubr.msk.bf16.vlgmr.msra.gmra.mrb[0].mxu1 %vm144_vm4, %v104_v23 }
 0x1ba   :  { %v182_v27 = vpop.f32.mrb[0].mxu1 }
 0x1bb   :  { %v183_v28 = vadd.f32 %v304_v26, %v182_v27  ;;  %v347_v29 = vpop.f32.mrb[1].mxu1 }
 0x1bc   :  { %v185_v30 = vpop.f32.mrb[2].mxu1 }
 0x1bd   :  { %v191_v31 = vmul.f32 0.01, %v183_v28  ;;  %v186_v32 = vadd.f32 %v304_v26, %v185_v30  ;;  %v348_v33 = vpop.f32.mrb[3].mxu1  ;;  %vm189_vm5 = vcmp.gt.f32.partialorder %v183_v28, 0.0 }
 0x1bf   :  { %vm190_vm6 = vcmp.gt.f32.partialorder %v186_v32, 0.0  ;;  %v192_v34 = vmul.f32 0.01, %v186_v32  ;;  %v193_v35 = vsel %vm189_vm5, %v183_v28, %v191_v31 }
 0x1c1   :  { %v194_v36 = vsel %vm190_vm6, %v186_v32, %v192_v34 }
 0x1c2   :  { %v195_v37 = vpack.c.bf16 %v194_v36, %v193_v35 }
 0x1c4   :  { %358 = vmatmul.mubr.msk.bf16.vlgmr.msra.gmra.mrb[4].mxu0 %vm144_vm4, %v195_v37 }
 0x297   :  { %v272_v39 = vpop.f32.mrb[4].mxu0 }
 0x298   :  { %v273_v40 = vadd.f32 %v310_v38, %v272_v39  ;;  %v359_v41 = vpop.f32.mrb[5].mxu0 }
 0x299   :  { %v275_v42 = vpop.f32.mrb[6].mxu0 }
 0x29a   :  { %v276_v43 = vadd.f32 %v310_v38, %v275_v42  ;;  %v360_v44 = vpop.f32.mrb[7].mxu0  ;;  %v279_v45 = vmul.f32 %v273_v40, %v273_v40 }
 0x29c   :  { %v282_v46 = vsel %vm281_vm7, %v279_v45, 0.0  ;;  %v280_v47 = vmul.f32 %v276_v43, %v276_v43 }
 0x29d   :  { %283 = vadd.xlane.f32.xlu0 %v282_v46 }
 0x29e   :  { %v285_v48 = vsel %vm281_vm7, %v280_v47, 0.0 }
 0x2a1   :  { %286 = vadd.xlane.f32.xlu0 %v285_v48 }
 0x32a   :  { %v284_v49 = vpop.xlane.xlu0 %283 }
 0x32b   :  { %v288_v50 = vmax.f32 %v284_v49, 1e-24 }
 0x32d   :  { %373 = vrsqrt.f32 %v288_v50 }
 0x32e   :  { %v287_v51 = vpop.xlane.xlu0 %286 }
 0x32f   :  { %v289_v52 = vmax.f32 %v287_v51, 1e-24 }
 0x331   :  { %375 = vrsqrt.f32 %v289_v52 }
 0x337   :  { %v374_v53 = vpop.eup %373 }
 0x338   :  { %v292_v54 = vmul.f32 %v374_v53, %v273_v40 }
 0x33a   :  { %294 = vst.msk [vmem:[%s486_s7] sm:$0xff] %vm281_vm7, %v292_v54 }
 0x33b   :  { %v376_v55 = vpop.eup %375 }
 0x33c   :  { %v293_v56 = vmul.f32 %v376_v55, %v276_v43 }
 0x33e   :  { %295 = vst.msk [vmem:[%s486_s7 + $0x8] sm:$0xff] %vm281_vm7, %v293_v56 }

</bundles_post_ra>
